<compile_context>
chip_gen: v5e
topology: v5e:2x2
jax: 0.10.0
libtpu: 0.0.40
codegen_flags: <defaults>
</compile_context>

<pallas_src>
import functools
import math

import jax
import jax.numpy as jnp
import numpy as np
from jax import lax
from jax.experimental import pallas as pl
from jax.experimental.pallas import tpu as pltpu


_TE_DEFAULT = 512                       # entity rows scored per grid step
_VMEM_LIMIT_BYTES = 40 * 1024 * 1024    # conservative for v7x (64 MiB physical)


def _pick_entity_tile(n_ent, target):
    """Full dim for tiny problems; otherwise a multiple of 128, capped so the
    grid has >= 2 steps (keeps both v7x TensorCores busy)."""
    if n_ent <= 256:
        return n_ent
    t = min(target, n_ent // 2)
    return max(128, (t // 128) * 128)


# ----------------------------------------------------------------------------
# Fused kernel: per entity tile
#   emb_tile = emb0_tile * (alpha*scale) + feat_tile @ W          (f32, in VMEM)
#     (W already holds [mats_img; mats_ling] * gamma*scale^2, bf16)
#   score_tile = q @ emb_tile^T                                   (B, te)
# ----------------------------------------------------------------------------
def _fused_embed_score_kernel(c_ref, q_ref, feat_ref, e0_ref, w_ref, out_ref):
    # bf16 feature/weight streams, f32 MXU accumulation.
    emb = jnp.dot(feat_ref[...], w_ref[...], preferred_element_type=jnp.float32)
    emb = e0_ref[...] * c_ref[0] + emb          # c_ref[0] = alpha*scale
    # scores: (B, te) = q (B,K) contracted with emb (te,K) on K (no transpose op)
    out_ref[...] = lax.dot_general(
        q_ref[...], emb.astype(jnp.bfloat16),
        dimension_numbers=(((1,), (1,)), ((), ())),
        preferred_element_type=jnp.float32)


def fused_embed_and_score(q_bf16, feat_bf16, emb0, w_bf16, c0, *, te=_TE_DEFAULT):
    b, two_rank = q_bf16.shape
    n_ent, k_feat = feat_bf16.shape
    te = _pick_entity_tile(n_ent, te)
    grid = (pl.cdiv(n_ent, te),)
    coef = jnp.reshape(c0, (1,)).astype(jnp.float32)

    # TODO(synk): mark the constant-index resident operands (q, W) with
    # pipeline_mode=pl.Buffered(1) once verified on the target jax version, to
    # avoid pointless double-buffering of resident VMEM.
    return pl.pallas_call(
        _fused_embed_score_kernel,
        out_shape=jax.ShapeDtypeStruct((b, n_ent), jnp.float32),
        grid=grid,
        in_specs=[
            pl.BlockSpec(memory_space=pltpu.MemorySpace.SMEM),    # alpha*scale
            pl.BlockSpec((b, two_rank), lambda j: (0, 0)),        # q (resident, bf16)
            pl.BlockSpec((te, k_feat), lambda j: (j, 0)),         # features (stream, bf16)
            pl.BlockSpec((te, two_rank), lambda j: (j, 0)),       # emb0 (stream, f32)
            pl.BlockSpec((k_feat, two_rank), lambda j: (0, 0)),   # stacked W (resident, bf16)
        ],
        out_specs=pl.BlockSpec((b, te), lambda j: (0, j)),        # lane-dense score tile
        compiler_params=pltpu.CompilerParams(
            dimension_semantics=("parallel",),
            vmem_limit_bytes=_VMEM_LIMIT_BYTES),
    )(coef, q_bf16, feat_bf16, emb0, w_bf16)


# ----------------------------------------------------------------------------
# model_fb forward (tiny gathered rows / regularizers in plain JAX, f32)
# ----------------------------------------------------------------------------
def model_fb_forward(params, x, rank, scale=0.2, te=_TE_DEFAULT):
    alpha = params["alpha"][0]
    gamma = params["gamma"][0]
    c0 = alpha * scale              # multiplies emb0 inside the kernel
    c1 = gamma * scale * scale      # folded into the (small) projection weights

    # stacked projection weight (K_feat x 2*rank -- tiny), pre-scaled, bf16
    w = jnp.concatenate([params["mats_img"], params["mats_ling"]], axis=0)
    w_bf16 = (w * c1).astype(jnp.bfloat16)

    # B gathered rows for lhs / rhs, computed exactly in f32 (tiny matmuls)
    def embed_rows(idx):
        fused = (params["img_vec"][idx] @ params["mats_img"]
                 + params["ling_vec"][idx] @ params["mats_ling"])
        return params["emb0"][idx] * c0 + fused * c1

    lhs = embed_rows(x[:, 0])
    rhs = embed_rows(x[:, 2])
    rel = params["emb1"][x[:, 1]]

    lr, li = lhs[:, :rank], lhs[:, rank:]
    rr, ri = rel[:, :rank], rel[:, rank:]
    # grid-invariant query, hoisted out of the kernel
    q = jnp.concatenate([lr * rr - li * ri, lr * ri + li * rr], axis=-1)

    scores = fused_embed_and_score(q.astype(jnp.bfloat16), params["feat_bf16"],
                                   params["emb0"], w_bf16, c0, te=te)

    def mag(t):  # regularizer magnitudes: tiny elementwise op, plain JAX, f32
        return jnp.sqrt(t[:, :rank] ** 2 + t[:, rank:] ** 2)

    return scores, (mag(lhs), mag(rel), mag(rhs))


# ----------------------------------------------------------------------------
# Pure-JAX f32 reference for sanity checking
# ----------------------------------------------------------------------------
def model_fb_reference(params, x, rank, scale=0.2):
    img_emb = params["img_vec"] @ params["mats_img"]
    ling_emb = params["ling_vec"] @ params["mats_ling"]
    fused = (img_emb + ling_emb) * scale
    embedding = (params["emb0"] * params["alpha"][0]
                 + fused * params["gamma"][0]) * scale
    lhs = embedding[x[:, 0]]
    rel = params["emb1"][x[:, 1]]
    rhs = embedding[x[:, 2]]
    lr, li = lhs[:, :rank], lhs[:, rank:]
    rr, ri = rel[:, :rank], rel[:, rank:]
    er, ei = embedding[:, :rank], embedding[:, rank:]
    scores = (lr * rr - li * ri) @ er.T + (lr * ri + li * rr) @ ei.T
    reg = (jnp.sqrt(lr ** 2 + li ** 2),
           jnp.sqrt(rr ** 2 + ri ** 2),
           jnp.sqrt(rhs[:, :rank] ** 2 + rhs[:, rank:] ** 2))
    return scores, reg


def init_params(key, sizes, rank, img_dim, ling_dim, init_size=1e-3):
    n_ent, n_rel = sizes[0], sizes[1]
    ks = jax.random.split(key, 6)
    # synthetic stand-ins for the pre-trained .npy feature matrices
    img_vec = jax.random.normal(ks[0], (n_ent, img_dim), jnp.float32)
    ling_vec = jax.random.normal(ks[1], (n_ent, ling_dim), jnp.float32)
    # xavier_uniform_
    lim_img = math.sqrt(6.0 / (img_dim + 2 * rank))
    lim_ling = math.sqrt(6.0 / (ling_dim + 2 * rank))
    mats_img = jax.random.uniform(ks[2], (img_dim, 2 * rank), jnp.float32,
                                  -lim_img, lim_img)
    mats_ling = jax.random.uniform(ks[3], (ling_dim, 2 * rank), jnp.float32,
                                   -lim_ling, lim_ling)
    # nn.Embedding default N(0,1), scaled by init_size
    emb0 = jax.random.normal(ks[4], (n_ent, 2 * rank), jnp.float32) * init_size
    emb1 = jax.random.normal(ks[5], (n_rel, 2 * rank), jnp.float32) * init_size
    return {
        "img_vec": img_vec, "ling_vec": ling_vec,
        # concatenated bf16 feature stream, built ONCE (features are frozen buffers)
        "feat_bf16": jnp.concatenate([img_vec, ling_vec],
                                     axis=1).astype(jnp.bfloat16),
        "mats_img": mats_img, "mats_ling": mats_ling,
        "emb0": emb0, "emb1": emb1,
        "alpha": jnp.array([0.5], jnp.float32),
        "gamma": jnp.array([0.5], jnp.float32),
    }


if __name__ == "__main__":
    sizes = (512, 32, 512)       # (n_entities, n_relations, n_entities)
    rank = 64                    # complex rank -> embeddings are 2*rank = 128 wide
    img_dim, ling_dim = 64, 48
    batch = 8

    key = jax.random.PRNGKey(0)
    kp, kq = jax.random.split(key)
    params = init_params(kp, sizes, rank, img_dim, ling_dim, init_size=0.1)

    heads = jax.random.randint(jax.random.fold_in(kq, 0), (batch,), 0, sizes[0])
    rels = jax.random.randint(jax.random.fold_in(kq, 1), (batch,), 0, sizes[1])
    tails = jax.random.randint(jax.random.fold_in(kq, 2), (batch,), 0, sizes[0])
    x = jnp.stack([heads, rels, tails], axis=1).astype(jnp.int32)

    # small tile so the test exercises a multi-step grid (512/128 = 4 steps)
    fwd = jax.jit(functools.partial(model_fb_forward, rank=rank, te=128))
    scores, reg = fwd(params, x)
    jax.block_until_ready((scores, reg))

    ref_scores, ref_reg = model_fb_reference(params, x, rank)
    np.testing.assert_allclose(np.asarray(scores), np.asarray(ref_scores),
                               rtol=5e-2, atol=2e-4)
    for a, b in zip(reg, ref_reg):
        np.testing.assert_allclose(np.asarray(a), np.asarray(b),
                                   rtol=1e-3, atol=1e-5)

    print("KERNEL_OK")
</pallas_src>

<mosaic_0001>
module attributes {stable_mosaic.version = 11 : i64} {
  func.func @_fused_embed_score_kernel(%arg0: i32, %arg1: memref<1xf32, #tpu.memory_space<smem>>, %arg2: memref<8x128xbf16, #tpu.memory_space<vmem>>, %arg3: memref<128x112xbf16, #tpu.memory_space<vmem>>, %arg4: memref<128x128xf32, #tpu.memory_space<vmem>>, %arg5: memref<112x128xbf16, #tpu.memory_space<vmem>>, %arg6: memref<8x128xf32, #tpu.memory_space<vmem>>) attributes {dimension_semantics = [#tpu.dimension_semantics<parallel>], iteration_bounds = array<i64: 4>, scalar_prefetch = 0 : i64, scratch_operands = 0 : i64, tpu.core_type = #tpu.core_type<tc>, window_params = [{transform_indices = @transform_0, window_bounds = array<i64: 1>}, {pipeline_mode = #tpu.pipeline_mode<synchronous>, transform_indices = @transform_1, window_bounds = array<i64: 8, 128>}, {transform_indices = @transform_2, window_bounds = array<i64: 128, 112>}, {transform_indices = @transform_3, window_bounds = array<i64: 128, 128>}, {pipeline_mode = #tpu.pipeline_mode<synchronous>, transform_indices = @transform_4, window_bounds = array<i64: 112, 128>}, {transform_indices = @transform_5, window_bounds = array<i64: 8, 128>}]} {
    %c0 = arith.constant 0 : index
    %c0_0 = arith.constant 0 : index
    %0 = vector.load %arg3[%c0, %c0_0] : memref<128x112xbf16, #tpu.memory_space<vmem>>, vector<128x112xbf16>
    %c0_1 = arith.constant 0 : index
    %c0_2 = arith.constant 0 : index
    %1 = vector.load %arg5[%c0_1, %c0_2] : memref<112x128xbf16, #tpu.memory_space<vmem>>, vector<112x128xbf16>
    %cst = arith.constant dense<0.000000e+00> : vector<128x128xf32>
    %2 = tpu.matmul %0, %1, %cst {dimension_numbers = #tpu.dot_dimension_numbers<[1], [0], [0], [1], [0, 0, 1, 1], [], []>} : vector<128x112xbf16>, vector<112x128xbf16>, vector<128x128xf32> -> vector<128x128xf32>
    %c0_3 = arith.constant 0 : index
    %c0_4 = arith.constant 0 : index
    %3 = vector.load %arg4[%c0_3, %c0_4] : memref<128x128xf32, #tpu.memory_space<vmem>>, vector<128x128xf32>
    %c0_5 = arith.constant 0 : index
    %4 = memref.load %arg1[%c0_5] : memref<1xf32, #tpu.memory_space<smem>>
    %5 = vector.broadcast %4 : f32 to vector<128x128xf32>
    %6 = arith.mulf %3, %5 : vector<128x128xf32>
    %7 = arith.addf %6, %2 : vector<128x128xf32>
    %c0_6 = arith.constant 0 : index
    %c0_7 = arith.constant 0 : index
    %8 = vector.load %arg2[%c0_6, %c0_7] : memref<8x128xbf16, #tpu.memory_space<vmem>>, vector<8x128xbf16>
    %9 = arith.truncf %7 : vector<128x128xf32> to vector<128x128xbf16>
    %cst_8 = arith.constant dense<0.000000e+00> : vector<8x128xf32>
    %10 = tpu.matmul %8, %9, %cst_8 {dimension_numbers = #tpu.dot_dimension_numbers<[1], [1], [0], [0], [0, 0, 1, 0], [], []>} : vector<8x128xbf16>, vector<128x128xbf16>, vector<8x128xf32> -> vector<8x128xf32>
    %c0_9 = arith.constant 0 : index
    %c0_10 = arith.constant 0 : index
    %11 = vector.load %arg6[%c0_9, %c0_10] : memref<8x128xf32, #tpu.memory_space<vmem>>, vector<8x128xf32>
    tpu.vector_store %arg6[%c0_9, %c0_10], %10 {strides = array<i32>} : memref<8x128xf32, #tpu.memory_space<vmem>>, vector<8x128xf32>,
    return
  }
  func.func @transform_0(%arg0: i32) -> i32 {
    %c0_i32 = arith.constant 0 : i32
    %c0_i32_0 = arith.constant 0 : i32
    return %c0_i32 : i32
  }
  func.func @transform_1(%arg0: i32) -> (i32, i32) {
    %c0_i32 = arith.constant 0 : i32
    %c0_i32_0 = arith.constant 0 : i32
    %c0_i32_1 = arith.constant 0 : i32
    return %c0_i32, %c0_i32_0 : i32, i32
  }
  func.func @transform_2(%arg0: i32) -> (i32, i32) {
    %c0_i32 = arith.constant 0 : i32
    %c0_i32_0 = arith.constant 0 : i32
    return %arg0, %c0_i32 : i32, i32
  }
  func.func @transform_3(%arg0: i32) -> (i32, i32) {
    %c0_i32 = arith.constant 0 : i32
    %c0_i32_0 = arith.constant 0 : i32
    return %arg0, %c0_i32 : i32, i32
  }
  func.func @transform_4(%arg0: i32) -> (i32, i32) {
    %c0_i32 = arith.constant 0 : i32
    %c0_i32_0 = arith.constant 0 : i32
    %c0_i32_1 = arith.constant 0 : i32
    return %c0_i32, %c0_i32_0 : i32, i32
  }
  func.func @transform_5(%arg0: i32) -> (i32, i32) {
    %c0_i32 = arith.constant 0 : i32
    %c0_i32_0 = arith.constant 0 : i32
    return %c0_i32, %arg0 : i32, i32
  }
}

</mosaic_0001>

<bundles_post_ra>
// kernel: model_fb_forward.1
= control target key start
LH: loop header
LB: loop body
LE: loop exit
PB: predicated region body
PF: predicated region fallthrough
CT: control target
= control target key end

     0   :  { %s998_s0 = inlined_call_operand.<no memory space> [shape: f32[1], index: 0, kind: input, shape index: {}]   ;;  %s999_s1 = inlined_call_operand.vmem [shape: bf16[8,128], index: 1, kind: input, shape index: {}]   ;;  %s1000_s2 = inlined_call_operand.vmem [shape: bf16[512,112], index: 2, kind: input, shape index: {}]   ;;  %s1001_s3 = inlined_call_operand.vmem [shape: f32[512,128], index: 3, kind: input, shape index: {}]   ;;  %s1002_s4 = inlined_call_operand.vmem [shape: bf16[112,128], index: 4, kind: input, shape index: {}]   ;;  %s1003_s5 = inlined_call_operand.hbm [shape: f32[8,512], index: 5, kind: output, shape index: {}]  }
   0x1   :  { %10 = sst [smem:[#allocation2]] %s998_s0 }
   0x2   :  { %11 = vsyncpa [#allocation4], 0 }
   0x3   :  { %13 = vsyncpa [#allocation4 + $0x1], 0  ;;  %s841_s20 = smov 0   ;;  %s843_s21 = smov 0  }
   0x4   :  { %s845_s22 = smov 0   ;;  %s847_s23 = smov 0  }
   0x5 LB: > { %s862_s0 = sadd.s32 4294967295, %s806_s23   ;;  %s595_s24 = sadd.s32 4294967294, %s806_s23   ;;  %s806_s23 = sphi %s847_s23, %s1009_s23   ;;  %s802_s22 = sphi %s845_s22, %s1008_s22   ;;  %s798_s21 = sphi %s843_s21, %s1007_s21   ;;  %s794_s20 = sphi %s841_s20, %s1006_s20  }
   0x6   : > { %s866_s25 = sadd.s32 1, %s806_s23   ;;  %s141_s26 = sadd.s32 1, %s802_s22 }
   0x7   : > { %s138_s27 = ssub.s32 %s806_s23, %s866_s25  ;;  %p151_p0 = scmp.ne.s32.totalorder %s802_s22, %s798_s21 }
   0x8   : > { %p139_p1 = scmp.eq.s32.totalorder %s138_s27, 0  ;;  %p152_p2 = scmp.eq.s32.totalorder %s862_s0, 3 }
   0x9   : > { %p157_p3 = scmp.ne.s32.totalorder %s798_s21, %s794_s20  ;;  %p158_p4 = scmp.eq.s32.totalorder %s595_s24, 3 }
   0xa   : > { %s877_s28 = scalar_select %p139_p1, %s802_s22, %s141_s26  }
   0xb   : > { %p879_p5 = por %p152_p2, %p151_p0  ;;  %p883_p6 = por %p158_p4, %p157_p3 }
   0xc   : > { %p598_p7 = scmp.ge.s32.totalorder %s806_s23, 1  ;;  %p203_p8 = scmp.lt.s32.totalorder %s806_s23, 5 }
   0xe   : > { %p204_p9 = pnand %p598_p7, %p203_p8 }
   0xf   : > { %s600_s12 = sshll.u32 (!%p204_p9), %s862_s0, 4  ;;  %s451_s8 = sld [smem:[#allocation2]] (!%p204_p9) }
  0x10   : > { %207 = sbr.rel (%p204_p9) target bundleno = 406 (0x196), region = 40  ;;  %p237_p10 = scmp.lt.s32.totalorder (!%p204_p9), %s600_s12, 63 }
  0x11   : > { %s233_s15 = sand.u32 (!%p204_p9), 1, %s798_s21   ;;  %s673_s16 = sshll.u32 (!%p204_p9), %s862_s0, 3 }
  0x12   : > { %s599_s17 = sshll.u32 (!%p204_p9), %s233_s15, 3  ;;  %s519_s24 = scalar_lea.hbm (!%p204_p9), %s1003_s5, %s673_s16 }
  0x13   : > { %s235_s26 = scalar_lea.vmem (!%p204_p9), [#allocation3], %s599_s17  ;;  %s523_s6 = sshll.u32 (!%p204_p9), %s519_s24, 4  ;;  %s524_s6 = int_to_ptr.hbm [resolvable:$true] %s523_s6 }
  0x14   : > { %s521_s27 = sshll.u32 (!%p204_p9), %s235_s26, 4  ;;  %s764_s11 = scalar_lea.hbm (!%p204_p9), %s1003_s5, 32  ;;  %s522_s27 = int_to_ptr.vmem [resolvable:$true] %s521_s27 }
  0x15   : > { %v690_v0 = vld [vmem:[%s1002_s4 + $0x30] sm:$0xff]  ;;  %v689_v1 = vld [vmem:[%s1002_s4 + $0x28] sm:$0xff]  ;;  %v688_v2 = vld [vmem:[%s1002_s4 + $0x20] sm:$0xff]  ;;  %s1011_s12 = smov (!%p237_p10, %s600_s12), 63  ;;  %vm361_vm0 = vcmask 916480   ;;  %v927_v24 = vstv %s451_s8  ;;  %s758_s8 = sshra.s32 %s524_s6, 4  ;;  %s759_s8 = int_to_ptr.hbm [resolvable:$true] %s758_s8 }
  0x16   : > { %691 = vmatpush.bf16.msra.mxu2 %v690_v0  ;;  %692 = vmatpush.bf16.msra.mxu3 %v690_v0  ;;  %v687_v3 = vld [vmem:[%s1002_s4 + $0x18] sm:$0xff]  ;;  %v686_v4 = vld [vmem:[%s1002_s4 + $0x10] sm:$0xff]  ;;  %v685_v5 = vld [vmem:[%s1002_s4 + $0x8] sm:$0xff]  ;;  %s601_s19 = sshll.u32 %s1011_s12, 2  ;;  %s603_s9 = sshll.u32 %s1011_s12, 3 }
  0x17   : > { %387 = vmatpush.bf16.msra.mxu0 %v690_v0  ;;  %v684_v6 = vld [vmem:[%s1002_s4] sm:$0xff]  ;;  %s240_s7 = scalar_lea.vmem %s1000_s2, %s601_s19  ;;  %s923_s13 = scalar_lea.vmem %s1001_s3, %s603_s9 }
  0x18   : > { %v679_v7 = vld [vmem:[%s240_s7 + $0x18] sm:$0xff]  ;;  %v682_v8 = vld [vmem:[%s240_s7 + $0x30] sm:$0xff]  ;;  %v676_v9 = vld [vmem:[%s240_s7] sm:$0xff]  ;;  %s760_s9 = scalar_lea.hbm %s759_s8, 8  ;;  %p765_p0 = scmp.lt.s32.totalorder %s759_s8, %s1003_s5 }
  0x19   : > { %v680_v10 = vld [vmem:[%s240_s7 + $0x20] sm:$0xff]  ;;  %v683_v11 = vld [vmem:[%s240_s7 + $0x38] sm:$0xff]  ;;  %v677_v12 = vld [vmem:[%s240_s7 + $0x8] sm:$0xff]  ;;  %p761_p11 = scmp.ne.s32.totalorder %s759_s8, %s760_s9  ;;  %p766_p1 = scmp.lt.s32.totalorder %s764_s11, %s760_s9 }
  0x1a   : > { %693 = vmatpush.bf16.msra.mxu2 %v689_v1  ;;  %694 = vmatpush.bf16.msra.mxu3 %v689_v1  ;;  %v681_v13 = vld [vmem:[%s240_s7 + $0x28] sm:$0xff]  ;;  %v678_v14 = vld [vmem:[%s240_s7 + $0x10] sm:$0xff]  ;;  %v450_v23 = vld [vmem:[%s923_s13 + $0x78] sm:$0xff]  ;;  %s509_s7 = scalar_lea.sflag [#allocation4], %s233_s15 }
  0x1b   : > { %388 = vmatpush.bf16.msra.mxu0 %v689_v1  ;;  %v449_v22 = vld [vmem:[%s923_s13 + $0x70] sm:$0xff]  ;;  %v468_v27 = vmul.f32 %v927_v24, %v450_v23  ;;  %v448_v28 = vld [vmem:[%s923_s13 + $0x68] sm:$0xff]  ;;  %v447_v33 = vld [vmem:[%s923_s13 + $0x60] sm:$0xff]  ;;  %p762_p12 = pnand %p761_p11, %p879_p5  ;;  %p767_p2 = por %p766_p1, %p765_p0 }
  0x1c   : > { %v467_v26 = vmul.f32 %v927_v24, %v449_v22  ;;  %v466_v34 = vmul.f32 %v927_v24, %v448_v28  ;;  %v465_v36 = vmul.f32 %v927_v24, %v447_v33  ;;  %v445_v41 = vld [vmem:[%s923_s13 + $0x50] sm:$0xff]  ;;  %v446_v42 = vld [vmem:[%s923_s13 + $0x58] sm:$0xff]  ;;  %v444_v46 = vld [vmem:[%s923_s13 + $0x48] sm:$0xff] }
  0x1d   : > { %v463_v44 = vmul.f32 %v927_v24, %v445_v41  ;;  %v464_v45 = vmul.f32 %v927_v24, %v446_v42  ;;  %v443_v51 = vld [vmem:[%s923_s13 + $0x40] sm:$0xff]  ;;  %v462_v52 = vmul.f32 %v927_v24, %v444_v46  ;;  %v442_v56 = vld [vmem:[%s923_s13 + $0x38] sm:$0xff]  ;;  %v441_v58 = vld [vmem:[%s923_s13 + $0x30] sm:$0xff]  ;;  %p763_p13 = pneg %p762_p12 }
  0x1e   : > { %695 = vmatpush.bf16.msra.mxu2 %v688_v2  ;;  %696 = vmatpush.bf16.msra.mxu3 %v688_v2  ;;  %v461_v54 = vmul.f32 %v927_v24, %v443_v51  ;;  %v460_v60 = vmul.f32 %v927_v24, %v442_v56  ;;  %v459_v62 = vmul.f32 %v927_v24, %v441_v58  ;;  %v439_v0 = vld [vmem:[%s923_s13 + $0x20] sm:$0xff]  ;;  %v440_v1 = vld [vmem:[%s923_s13 + $0x28] sm:$0xff] }
  0x1f   : > { %389 = vmatpush.bf16.msra.mxu0 %v688_v2  ;;  %p768_p3 = pnand %p767_p2, %p763_p13 }
  0x22   : > { %697 = vmatpush.bf16.msra.mxu2 %v687_v3  ;;  %698 = vmatpush.bf16.msra.mxu3 %v687_v3 }
  0x23   : > { %390 = vmatpush.bf16.msra.mxu0 %v687_v3  ;;  %v457_v3 = vmul.f32 %v927_v24, %v439_v0 }
  0x26   : > { %699 = vmatpush.bf16.msra.mxu2 %v686_v4  ;;  %700 = vmatpush.bf16.msra.mxu3 %v686_v4 }
  0x27   : > { %391 = vmatpush.bf16.msra.mxu0 %v686_v4  ;;  %v458_v4 = vmul.f32 %v927_v24, %v440_v1 }
  0x2a   : > { %701 = vmatpush.bf16.msra.mxu2 %v685_v5  ;;  %702 = vmatpush.bf16.msra.mxu3 %v685_v5 }
  0x2b   : > { %392 = vmatpush.bf16.msra.mxu0 %v685_v5 }
  0x2e   : > { %703 = vmatpush.bf16.msra.mxu2 %v684_v6  ;;  %704 = vmatpush.bf16.msra.mxu3 %v684_v6 }
  0x2f   : > { %393 = vmatpush.bf16.msra.mxu0 %v684_v6 }
  0x31   : > { %667 = vmatmul.msk.bf16.vlgmr.msra.gmra.mxu2 %vm361_vm0, %v679_v7  ;;  %670 = vmatmul.msk.bf16.vlgmr.msra.gmra.mxu3 %vm361_vm0, %v682_v8 }
  0x32   : > { %664 = vmatmul.msk.bf16.vlgmr.msra.gmra.mxu0 %vm361_vm0, %v676_v9  ;;  %v437_v9 = vld [vmem:[%s923_s13 + $0x10] sm:$0xff] }
  0x41   : > { %668 = vmatmul.msk.bf16.gmra.mxu2 %vm361_vm0, %v680_v10  ;;  %671 = vmatmul.msk.bf16.gmra.mxu3 %vm361_vm0, %v683_v11  ;;  %v438_v10 = vld [vmem:[%s923_s13 + $0x18] sm:$0xff]  ;;  %v455_v11 = vmul.f32 %v927_v24, %v437_v9 }
  0x42   : > { %665 = vmatmul.msk.bf16.gmra.mxu0 %vm361_vm0, %v677_v12  ;;  %v456_v12 = vmul.f32 %v927_v24, %v438_v10 }
  0x51   : > { %669 = vmatmul.msk.bf16.gmra.mxu2 %vm361_vm0, %v681_v13 }
  0x52   : > { %666 = vmatmul.msk.bf16.gmra.mxu0 %vm361_vm0, %v678_v14 }
  0xaf   : > { %v917_v19 = vpop.f32.mrf.mxu0 }
  0xb4   : > { %v410_v15 = vpop.f32.mrf.mxu2  ;;  %v425_v16 = vpop.f32.mrf.mxu3 }
  0xb5   : > { %v481_v40 = vadd.f32 %v465_v36, %v425_v16  ;;  %v475_v2 = vadd.f32 %v459_v62, %v410_v15  ;;  %v435_v16 = vld [vmem:[%s923_s13] sm:$0xff] }
  0xb7   : > { %v929_v25 = vpop.f32.mrf.mxu0 }
  0xbc   : > { %v412_v17 = vpop.f32.mrf.mxu2  ;;  %v427_v18 = vpop.f32.mrf.mxu3 }
  0xbd   : > { %v482_v38 = vadd.f32 %v466_v34, %v427_v18  ;;  %v476_v63 = vadd.f32 %v460_v60, %v412_v17  ;;  %v436_v17 = vld [vmem:[%s923_s13 + $0x8] sm:$0xff]  ;;  %v453_v18 = vmul.f32 %v927_v24, %v435_v16 }
  0xbf   : > { %v400_v37 = vpop.f32.mrf.mxu0  ;;  %v492_v43 = vpack.c.bf16 %v482_v38, %v481_v40  ;;  %v489_v5 = vpack.c.bf16 %v476_v63, %v475_v2  ;;  %v469_v22 = vadd.f32 %v453_v18, %v917_v19 }
  0xc0   : > { %v471_v14 = vadd.f32 %v455_v11, %v400_v37 }
  0xc4   : > { %v415_v20 = vpop.f32.mrf.mxu2  ;;  %v430_v21 = vpop.f32.mrf.mxu3 }
  0xc5   : > { %v483_v31 = vadd.f32 %v467_v26, %v430_v21  ;;  %v477_v57 = vadd.f32 %v461_v54, %v415_v20  ;;  %v454_v20 = vmul.f32 %v927_v24, %v436_v17 }
  0xc7   : > { %v402_v47 = vpop.f32.mrf.mxu0  ;;  %v470_v23 = vadd.f32 %v454_v20, %v929_v25 }
  0xc8   : > { %v472_v15 = vadd.f32 %v456_v12, %v402_v47 }
  0xc9   : > { %v486_v26 = vpack.c.bf16 %v470_v23, %v469_v22 }
  0xca   : > { %v487_v21 = vpack.c.bf16 %v472_v15, %v471_v14 }
  0xcc   : > { %v417_v29 = vpop.f32.mrf.mxu2  ;;  %v432_v30 = vpop.f32.mrf.mxu3 }
  0xcd   : > { %v484_v32 = vadd.f32 %v468_v27, %v432_v30  ;;  %v478_v55 = vadd.f32 %v462_v52, %v417_v29  ;;  %v485_v27 = vld [vmem:[%s999_s1] sm:$0xf] }
  0xcf   : > { %v493_v35 = vpack.c.bf16 %v484_v32, %v483_v31  ;;  %v405_v59 = vpop.f32.mrf.mxu0  ;;  %v490_v61 = vpack.c.bf16 %v478_v55, %v477_v57 }
  0xd0   : > { %v473_v7 = vadd.f32 %v457_v3, %v405_v59 }
  0xd1   : > { %494 = vmatpush.bf16.xpose.msra.mxu1 %v493_v35 }
  0xd4   : > { %v420_v39 = vpop.f32.mrf.mxu2 }
  0xd5   : > { %v479_v49 = vadd.f32 %v463_v44, %v420_v39 }
  0xd7   : > { %v407_v6 = vpop.f32.mrf.mxu0 }
  0xd8   : > { %v474_v8 = vadd.f32 %v458_v4, %v407_v6 }
  0xd9   : > { %495 = vmatpush.bf16.xpose.msra.mxu1 %v492_v43 }
  0xda   : > { %v488_v13 = vpack.c.bf16 %v474_v8, %v473_v7 }
  0xdc   : > { %v422_v48 = vpop.f32.mrf.mxu2 }
  0xdd   : > { %v480_v50 = vadd.f32 %v464_v45, %v422_v48 }
  0xdf   : > { %v491_v53 = vpack.c.bf16 %v480_v50, %v479_v49 }
  0xe1   : > { %496 = vmatpush.bf16.xpose.msra.mxu1 %v491_v53 }
  0xe9   : > { %497 = vmatpush.bf16.xpose.msra.mxu1 %v490_v61 }
  0xf1   : > { %498 = vmatpush.bf16.xpose.msra.mxu1 %v489_v5 }
  0xf9   : > { %499 = vmatpush.bf16.xpose.msra.mxu1 %v488_v13 }
 0x101   : > { %500 = vmatpush.bf16.xpose.msra.mxu1 %v487_v21 }
 0x109   : > { %501 = vmatpush.bf16.xpose.msra.mxu1 %v486_v26 }
 0x110   : > { %502 = vmatmul.bf16.vlgmr.msra.gmra.mxu1 %v485_v27 }
 0x18d   : > { %v503_v19 = vpop.f32.mrf.mxu1 }
 0x18e   : > { %507 = vst [vmem:[%s235_s26] sm:$0xff] %v503_v19 }
 0x18f   : > { %771 = shalt.err (!%p768_p3)
}
 0x190   : > { %705 = dma.vmem_to_hbm [thread:$0]  (%p879_p5), %s522_s27, 128, %s524_s6, %s509_s7  }
 0x195   : > { %v505_v24 = vpop.f32.mrf.mxu1 }
 0x196 PF: > { %p711_p4 = scmp.ge.s32.totalorder %s806_s23, 2  ;;  %s535_s14 = sand.u32 1, %s794_s20  }
 0x197   : > { %s536_s15 = scalar_lea.sflag [#allocation4], %s535_s14 }
 0x198   : > { %p708_p7 = pnand %p711_p4, %p883_p6 }
 0x19a   : > { %p709_p8 = pneg %p708_p7 }
 0x19c   : > { %789 = dma.done.wait (%p709_p8), %s536_s15, 128  }
 0x19d   : > { %791 = vsyncadd (%p709_p8), %s536_s15, 4294967168  ;;  %p16_p9 = scmp.ge.s32.totalorder %s866_s25, 6   ;;  %s1006_s20 = smov %s798_s21 }
 0x19e   : > { %s1007_s21 = smov %s802_s22  ;;  %s1008_s22 = smov %s877_s28 }
 0x19f   : > { %s1009_s23 = smov %s866_s25  ;;  %18 = sbr.rel (!%p16_p9) target bundleno = 5 (0x5), region = 78 }
 0x1a4   :  { %542 = vsyncpa [#allocation4], 1 }
 0x1a5   :  { %544 = vsyncpa [#allocation4 + $0x1], 1 }

</bundles_post_ra>
